<compile_context>
chip_gen: v7x
topology: tpu7x:2x2x1
jax: 0.10.0
libtpu: 0.0.40
codegen_flags: <defaults>
</compile_context>

<pallas_src>
import jax
import jax.numpy as jnp
from jax.experimental import pallas as pl
from jax.experimental.pallas import tpu as pltpu


def _make_sglu_kernel(pep_len, in_ch, hidden, has_bias):
    """Build the SGLU kernel for static (L, C, H) and bias presence."""

    def kernel(*refs):
        if has_bias:
            x_ref, w_ref, b_ref, out_ref, gate_ref = refs
        else:
            x_ref, w_ref, out_ref, gate_ref = refs
            b_ref = None
        # x_ref:    (B, L*C)   activations, flat per-position channels
        # w_ref:    (L, C, 2H) raw packed weights [W_act | W_gate]
        # b_ref:    (L, 2H)    raw packed biases  [b_act | b_gate]
        # out_ref / gate_ref: (B, L*H)
        for l in range(pep_len):  # static unroll; L is small (8)
            x_l = x_ref[:, l * in_ch:(l + 1) * in_ch]                # (B, C)
            y = jnp.dot(x_l, w_ref[l],
                        preferred_element_type=jnp.float32)          # (B, 2H)
            if has_bias:
                y = y + b_ref[l:l + 1, :].astype(jnp.float32)        # (1, 2H)
            act = y[:, :hidden]
            gate = jax.nn.sigmoid(y[:, hidden:])                     # EUP path
            out_ref[:, l * hidden:(l + 1) * hidden] = (
                act * gate).astype(out_ref.dtype)
            gate_ref[:, l * hidden:(l + 1) * hidden] = gate.astype(
                gate_ref.dtype)

    return kernel


def prepare_sglu_params(w_act, w_gate, b_act=None, b_gate=None):
    """ONE-TIME parameter packing (call when params are created/updated).

    w_act/w_gate: (L, C, H) -> w_pack (L, C, 2H)
    b_act/b_gate: (L, H)    -> b_pack (L, 2H) or None
    """
    w_pack = jnp.concatenate([w_act, w_gate], axis=-1)
    b_pack = None
    if b_act is not None:
        assert b_gate is not None
        b_pack = jnp.concatenate([b_act, b_gate], axis=-1)
    return w_pack, b_pack


def sglu_forward(x, w_pack, b_pack=None):
    """SGLU forward.

    x: (B, L, C); w_pack: (L, C, 2H); b_pack: (L, 2H) or None.
    Returns (out, gate), each (B, L, H).
    """
    B, L, C = x.shape
    Lw, Cw, H2 = w_pack.shape
    assert (L, C) == (Lw, Cw) and H2 % 2 == 0
    H = H2 // 2
    LH = L * H

    x_flat = x.reshape(B, L * C)  # contiguous reshape, no HBM relayout

    has_bias = b_pack is not None
    kernel = _make_sglu_kernel(L, C, H, has_bias)

    bytes_accessed = (
        x_flat.size * x_flat.dtype.itemsize
        + w_pack.size * w_pack.dtype.itemsize
        + (b_pack.size * b_pack.dtype.itemsize if has_bias else 0)
        + 2 * B * LH * x.dtype.itemsize)
    cost = pl.CostEstimate(
        flops=2 * B * L * C * H2,          # both fused matmuls
        transcendentals=B * LH,            # one exp per gate element
        bytes_accessed=int(bytes_accessed))

    vmem = lambda: pl.BlockSpec(memory_space=pltpu.MemorySpace.VMEM)
    args = (x_flat, w_pack) + ((b_pack,) if has_bias else ())

    out_flat, gate_flat = pl.pallas_call(
        kernel,
        out_shape=(jax.ShapeDtypeStruct((B, LH), x.dtype),
                   jax.ShapeDtypeStruct((B, LH), x.dtype)),
        in_specs=[vmem() for _ in args],
        out_specs=(vmem(), vmem()),
        cost_estimate=cost,
    )(*args)

    return out_flat.reshape(B, L, H), gate_flat.reshape(B, L, H)


if __name__ == "__main__":
    # Small shapes consistent with the module.
    B, PEP_LEN, IN_CH, HIDDEN = 2, 8, 32, 32

    key = jax.random.PRNGKey(0)
    k_x, k_wa, k_wg, k_ba, k_bg = jax.random.split(key, 5)

    # Deterministic synthetic parameters (truncated-normal std=0.02 weights,
    # small non-zero biases to exercise the bias path).
    w_act = 0.02 * jax.random.truncated_normal(
        k_wa, -2.0, 2.0, (PEP_LEN, IN_CH, HIDDEN), dtype=jnp.float32)
    w_gate = 0.02 * jax.random.truncated_normal(
        k_wg, -2.0, 2.0, (PEP_LEN, IN_CH, HIDDEN), dtype=jnp.float32)
    b_act = 0.1 * jax.random.normal(k_ba, (PEP_LEN, HIDDEN), dtype=jnp.float32)
    b_gate = 0.1 * jax.random.normal(k_bg, (PEP_LEN, HIDDEN), dtype=jnp.float32)

    x = jax.random.normal(k_x, (B, PEP_LEN, IN_CH), dtype=jnp.float32)

    # One-time parameter packing, outside the forward path.
    w_pack, b_pack = prepare_sglu_params(w_act, w_gate, b_act, b_gate)
    w_pack, b_pack = jax.block_until_ready((w_pack, b_pack))

    sglu_jit = jax.jit(sglu_forward)
    out, gate = sglu_jit(x, w_pack, b_pack)
    out, gate = jax.block_until_ready((out, gate))

    # Pure-JAX reference of the PyTorch SGLU forward.
    pre_a = jnp.einsum("blc,lch->blh", x, w_act) + b_act[None]
    pre_g = jnp.einsum("blc,lch->blh", x, w_gate) + b_gate[None]
    gate_ref = jax.nn.sigmoid(pre_g)
    out_ref = pre_a * gate_ref

    assert out.shape == (B, PEP_LEN, HIDDEN) and gate.shape == (B, PEP_LEN, HIDDEN)
    assert jnp.allclose(out, out_ref, atol=1e-5, rtol=1e-5)
    assert jnp.allclose(gate, gate_ref, atol=1e-5, rtol=1e-5)

    print("KERNEL_OK")
</pallas_src>

<mosaic_0001>
module attributes {stable_mosaic.version = 11 : i64} {
  func.func @kernel(%arg0: memref<2x256xf32, #tpu.memory_space<vmem>>, %arg1: memref<8x32x64xf32, #tpu.memory_space<vmem>>, %arg2: memref<8x64xf32, #tpu.memory_space<vmem>>, %arg3: memref<2x256xf32, #tpu.memory_space<vmem>>, %arg4: memref<2x256xf32, #tpu.memory_space<vmem>>) attributes {dimension_semantics = [], scalar_prefetch = 0 : i64, scratch_operands = 0 : i64, tpu.core_type = #tpu.core_type<tc>} {
    %c0 = arith.constant 0 : index
    %c0_0 = arith.constant 0 : index
    %0 = vector.load %arg0[%c0, %c0_0] : memref<2x256xf32, #tpu.memory_space<vmem>>, vector<2x32xf32>
    %c0_1 = arith.constant 0 : index
    %c0_2 = arith.constant 0 : index
    %c0_3 = arith.constant 0 : index
    %1 = vector.load %arg1[%c0_1, %c0_2, %c0_3] : memref<8x32x64xf32, #tpu.memory_space<vmem>>, vector<1x32x64xf32>
    %2 = vector.shape_cast %1 : vector<1x32x64xf32> to vector<32x64xf32>
    %cst = arith.constant dense<0.000000e+00> : vector<2x64xf32>
    %3 = tpu.matmul %0, %2, %cst {dimension_numbers = #tpu.dot_dimension_numbers<[1], [0], [0], [1], [0, 0, 1, 1], [], []>} : vector<2x32xf32>, vector<32x64xf32>, vector<2x64xf32> -> vector<2x64xf32>
    %c0_4 = arith.constant 0 : index
    %c0_5 = arith.constant 0 : index
    %4 = vector.load %arg2[%c0_4, %c0_5] : memref<8x64xf32, #tpu.memory_space<vmem>>, vector<1x64xf32>
    %5 = vector.broadcast %4 : vector<1x64xf32> to vector<2x64xf32>
    %6 = arith.addf %3, %5 : vector<2x64xf32>
    %7 = vector.extract_strided_slice %6 {offsets = [0, 0], sizes = [2, 32], strides = [1, 1]} : vector<2x64xf32> to vector<2x32xf32>
    %8 = vector.extract_strided_slice %6 {offsets = [0, 32], sizes = [2, 32], strides = [1, 1]} : vector<2x64xf32> to vector<2x32xf32>
    %9 = arith.negf %8 : vector<2x32xf32>
    %10 = math.exp %9 : vector<2x32xf32>
    %cst_6 = arith.constant 1.000000e+00 : f32
    %11 = vector.broadcast %cst_6 : f32 to vector<2x32xf32>
    %12 = arith.addf %11, %10 : vector<2x32xf32>
    %13 = arith.divf %11, %12 : vector<2x32xf32>
    %14 = arith.mulf %7, %13 : vector<2x32xf32>
    %c0_7 = arith.constant 0 : index
    %c0_8 = arith.constant 0 : index
    %15 = vector.load %arg3[%c0_7, %c0_8] : memref<2x256xf32, #tpu.memory_space<vmem>>, vector<2x32xf32>
    tpu.vector_store %arg3[%c0_7, %c0_8], %14 {strides = array<i32>} : memref<2x256xf32, #tpu.memory_space<vmem>>, vector<2x32xf32>,
    %c0_9 = arith.constant 0 : index
    %c0_10 = arith.constant 0 : index
    %16 = vector.load %arg4[%c0_9, %c0_10] : memref<2x256xf32, #tpu.memory_space<vmem>>, vector<2x32xf32>
    tpu.vector_store %arg4[%c0_9, %c0_10], %13 {strides = array<i32>} : memref<2x256xf32, #tpu.memory_space<vmem>>, vector<2x32xf32>,
    %c0_11 = arith.constant 0 : index
    %c32 = arith.constant 32 : index
    %17 = vector.load %arg0[%c0_11, %c32] : memref<2x256xf32, #tpu.memory_space<vmem>>, vector<2x32xf32>
    %c1 = arith.constant 1 : index
    %c0_12 = arith.constant 0 : index
    %c0_13 = arith.constant 0 : index
    %18 = vector.load %arg1[%c1, %c0_12, %c0_13] : memref<8x32x64xf32, #tpu.memory_space<vmem>>, vector<1x32x64xf32>
    %19 = vector.shape_cast %18 : vector<1x32x64xf32> to vector<32x64xf32>
    %cst_14 = arith.constant dense<0.000000e+00> : vector<2x64xf32>
    %20 = tpu.matmul %17, %19, %cst_14 {dimension_numbers = #tpu.dot_dimension_numbers<[1], [0], [0], [1], [0, 0, 1, 1], [], []>} : vector<2x32xf32>, vector<32x64xf32>, vector<2x64xf32> -> vector<2x64xf32>
    %c1_15 = arith.constant 1 : index
    %c0_16 = arith.constant 0 : index
    %21 = vector.load %arg2[%c1_15, %c0_16] : memref<8x64xf32, #tpu.memory_space<vmem>>, vector<1x64xf32>
    %22 = vector.broadcast %21 : vector<1x64xf32> to vector<2x64xf32>
    %23 = arith.addf %20, %22 : vector<2x64xf32>
    %24 = vector.extract_strided_slice %23 {offsets = [0, 0], sizes = [2, 32], strides = [1, 1]} : vector<2x64xf32> to vector<2x32xf32>
    %25 = vector.extract_strided_slice %23 {offsets = [0, 32], sizes = [2, 32], strides = [1, 1]} : vector<2x64xf32> to vector<2x32xf32>
    %26 = arith.negf %25 : vector<2x32xf32>
    %27 = math.exp %26 : vector<2x32xf32>
    %cst_17 = arith.constant 1.000000e+00 : f32
    %28 = vector.broadcast %cst_17 : f32 to vector<2x32xf32>
    %29 = arith.addf %28, %27 : vector<2x32xf32>
    %30 = arith.divf %28, %29 : vector<2x32xf32>
    %31 = arith.mulf %24, %30 : vector<2x32xf32>
    %c0_18 = arith.constant 0 : index
    %c32_19 = arith.constant 32 : index
    %32 = vector.load %arg3[%c0_18, %c32_19] : memref<2x256xf32, #tpu.memory_space<vmem>>, vector<2x32xf32>
    tpu.vector_store %arg3[%c0_18, %c32_19], %31 {strides = array<i32>} : memref<2x256xf32, #tpu.memory_space<vmem>>, vector<2x32xf32>,
    %c0_20 = arith.constant 0 : index
    %c32_21 = arith.constant 32 : index
    %33 = vector.load %arg4[%c0_20, %c32_21] : memref<2x256xf32, #tpu.memory_space<vmem>>, vector<2x32xf32>
    tpu.vector_store %arg4[%c0_20, %c32_21], %30 {strides = array<i32>} : memref<2x256xf32, #tpu.memory_space<vmem>>, vector<2x32xf32>,
    %c0_22 = arith.constant 0 : index
    %c64 = arith.constant 64 : index
    %34 = vector.load %arg0[%c0_22, %c64] : memref<2x256xf32, #tpu.memory_space<vmem>>, vector<2x32xf32>
    %c2 = arith.constant 2 : index
    %c0_23 = arith.constant 0 : index
    %c0_24 = arith.constant 0 : index
    %35 = vector.load %arg1[%c2, %c0_23, %c0_24] : memref<8x32x64xf32, #tpu.memory_space<vmem>>, vector<1x32x64xf32>
    %36 = vector.shape_cast %35 : vector<1x32x64xf32> to vector<32x64xf32>
    %cst_25 = arith.constant dense<0.000000e+00> : vector<2x64xf32>
    %37 = tpu.matmul %34, %36, %cst_25 {dimension_numbers = #tpu.dot_dimension_numbers<[1], [0], [0], [1], [0, 0, 1, 1], [], []>} : vector<2x32xf32>, vector<32x64xf32>, vector<2x64xf32> -> vector<2x64xf32>
    %c2_26 = arith.constant 2 : index
    %c0_27 = arith.constant 0 : index
    %38 = vector.load %arg2[%c2_26, %c0_27] : memref<8x64xf32, #tpu.memory_space<vmem>>, vector<1x64xf32>
    %39 = vector.broadcast %38 : vector<1x64xf32> to vector<2x64xf32>
    %40 = arith.addf %37, %39 : vector<2x64xf32>
    %41 = vector.extract_strided_slice %40 {offsets = [0, 0], sizes = [2, 32], strides = [1, 1]} : vector<2x64xf32> to vector<2x32xf32>
    %42 = vector.extract_strided_slice %40 {offsets = [0, 32], sizes = [2, 32], strides = [1, 1]} : vector<2x64xf32> to vector<2x32xf32>
    %43 = arith.negf %42 : vector<2x32xf32>
    %44 = math.exp %43 : vector<2x32xf32>
    %cst_28 = arith.constant 1.000000e+00 : f32
    %45 = vector.broadcast %cst_28 : f32 to vector<2x32xf32>
    %46 = arith.addf %45, %44 : vector<2x32xf32>
    %47 = arith.divf %45, %46 : vector<2x32xf32>
    %48 = arith.mulf %41, %47 : vector<2x32xf32>
    %c0_29 = arith.constant 0 : index
    %c64_30 = arith.constant 64 : index
    %49 = vector.load %arg3[%c0_29, %c64_30] : memref<2x256xf32, #tpu.memory_space<vmem>>, vector<2x32xf32>
    tpu.vector_store %arg3[%c0_29, %c64_30], %48 {strides = array<i32>} : memref<2x256xf32, #tpu.memory_space<vmem>>, vector<2x32xf32>,
    %c0_31 = arith.constant 0 : index
    %c64_32 = arith.constant 64 : index
    %50 = vector.load %arg4[%c0_31, %c64_32] : memref<2x256xf32, #tpu.memory_space<vmem>>, vector<2x32xf32>
    tpu.vector_store %arg4[%c0_31, %c64_32], %47 {strides = array<i32>} : memref<2x256xf32, #tpu.memory_space<vmem>>, vector<2x32xf32>,
    %c0_33 = arith.constant 0 : index
    %c96 = arith.constant 96 : index
    %51 = vector.load %arg0[%c0_33, %c96] : memref<2x256xf32, #tpu.memory_space<vmem>>, vector<2x32xf32>
    %c3 = arith.constant 3 : index
    %c0_34 = arith.constant 0 : index
    %c0_35 = arith.constant 0 : index
    %52 = vector.load %arg1[%c3, %c0_34, %c0_35] : memref<8x32x64xf32, #tpu.memory_space<vmem>>, vector<1x32x64xf32>
    %53 = vector.shape_cast %52 : vector<1x32x64xf32> to vector<32x64xf32>
    %cst_36 = arith.constant dense<0.000000e+00> : vector<2x64xf32>
    %54 = tpu.matmul %51, %53, %cst_36 {dimension_numbers = #tpu.dot_dimension_numbers<[1], [0], [0], [1], [0, 0, 1, 1], [], []>} : vector<2x32xf32>, vector<32x64xf32>, vector<2x64xf32> -> vector<2x64xf32>
    %c3_37 = arith.constant 3 : index
    %c0_38 = arith.constant 0 : index
    %55 = vector.load %arg2[%c3_37, %c0_38] : memref<8x64xf32, #tpu.memory_space<vmem>>, vector<1x64xf32>
    %56 = vector.broadcast %55 : vector<1x64xf32> to vector<2x64xf32>
    %57 = arith.addf %54, %56 : vector<2x64xf32>
    %58 = vector.extract_strided_slice %57 {offsets = [0, 0], sizes = [2, 32], strides = [1, 1]} : vector<2x64xf32> to vector<2x32xf32>
    %59 = vector.extract_strided_slice %57 {offsets = [0, 32], sizes = [2, 32], strides = [1, 1]} : vector<2x64xf32> to vector<2x32xf32>
    %60 = arith.negf %59 : vector<2x32xf32>
    %61 = math.exp %60 : vector<2x32xf32>
    %cst_39 = arith.constant 1.000000e+00 : f32
    %62 = vector.broadcast %cst_39 : f32 to vector<2x32xf32>
    %63 = arith.addf %62, %61 : vector<2x32xf32>
    %64 = arith.divf %62, %63 : vector<2x32xf32>
    %65 = arith.mulf %58, %64 : vector<2x32xf32>
    %c0_40 = arith.constant 0 : index
    %c96_41 = arith.constant 96 : index
    %66 = vector.load %arg3[%c0_40, %c96_41] : memref<2x256xf32, #tpu.memory_space<vmem>>, vector<2x32xf32>
    tpu.vector_store %arg3[%c0_40, %c96_41], %65 {strides = array<i32>} : memref<2x256xf32, #tpu.memory_space<vmem>>, vector<2x32xf32>,
    %c0_42 = arith.constant 0 : index
    %c96_43 = arith.constant 96 : index
    %67 = vector.load %arg4[%c0_42, %c96_43] : memref<2x256xf32, #tpu.memory_space<vmem>>, vector<2x32xf32>
    tpu.vector_store %arg4[%c0_42, %c96_43], %64 {strides = array<i32>} : memref<2x256xf32, #tpu.memory_space<vmem>>, vector<2x32xf32>,
    %c0_44 = arith.constant 0 : index
    %c128 = arith.constant 128 : index
    %68 = vector.load %arg0[%c0_44, %c128] : memref<2x256xf32, #tpu.memory_space<vmem>>, vector<2x32xf32>
    %c4 = arith.constant 4 : index
    %c0_45 = arith.constant 0 : index
    %c0_46 = arith.constant 0 : index
    %69 = vector.load %arg1[%c4, %c0_45, %c0_46] : memref<8x32x64xf32, #tpu.memory_space<vmem>>, vector<1x32x64xf32>
    %70 = vector.shape_cast %69 : vector<1x32x64xf32> to vector<32x64xf32>
    %cst_47 = arith.constant dense<0.000000e+00> : vector<2x64xf32>
    %71 = tpu.matmul %68, %70, %cst_47 {dimension_numbers = #tpu.dot_dimension_numbers<[1], [0], [0], [1], [0, 0, 1, 1], [], []>} : vector<2x32xf32>, vector<32x64xf32>, vector<2x64xf32> -> vector<2x64xf32>
    %c4_48 = arith.constant 4 : index
    %c0_49 = arith.constant 0 : index
    %72 = vector.load %arg2[%c4_48, %c0_49] : memref<8x64xf32, #tpu.memory_space<vmem>>, vector<1x64xf32>
    %73 = vector.broadcast %72 : vector<1x64xf32> to vector<2x64xf32>
    %74 = arith.addf %71, %73 : vector<2x64xf32>
    %75 = vector.extract_strided_slice %74 {offsets = [0, 0], sizes = [2, 32], strides = [1, 1]} : vector<2x64xf32> to vector<2x32xf32>
    %76 = vector.extract_strided_slice %74 {offsets = [0, 32], sizes = [2, 32], strides = [1, 1]} : vector<2x64xf32> to vector<2x32xf32>
    %77 = arith.negf %76 : vector<2x32xf32>
    %78 = math.exp %77 : vector<2x32xf32>
    %cst_50 = arith.constant 1.000000e+00 : f32
    %79 = vector.broadcast %cst_50 : f32 to vector<2x32xf32>
    %80 = arith.addf %79, %78 : vector<2x32xf32>
    %81 = arith.divf %79, %80 : vector<2x32xf32>
    %82 = arith.mulf %75, %81 : vector<2x32xf32>
    %c0_51 = arith.constant 0 : index
    %c128_52 = arith.constant 128 : index
    %83 = vector.load %arg3[%c0_51, %c128_52] : memref<2x256xf32, #tpu.memory_space<vmem>>, vector<2x32xf32>
    tpu.vector_store %arg3[%c0_51, %c128_52], %82 {strides = array<i32>} : memref<2x256xf32, #tpu.memory_space<vmem>>, vector<2x32xf32>,
    %c0_53 = arith.constant 0 : index
    %c128_54 = arith.constant 128 : index
    %84 = vector.load %arg4[%c0_53, %c128_54] : memref<2x256xf32, #tpu.memory_space<vmem>>, vector<2x32xf32>
    tpu.vector_store %arg4[%c0_53, %c128_54], %81 {strides = array<i32>} : memref<2x256xf32, #tpu.memory_space<vmem>>, vector<2x32xf32>,
    %c0_55 = arith.constant 0 : index
    %c160 = arith.constant 160 : index
    %85 = vector.load %arg0[%c0_55, %c160] : memref<2x256xf32, #tpu.memory_space<vmem>>, vector<2x32xf32>
    %c5 = arith.constant 5 : index
    %c0_56 = arith.constant 0 : index
    %c0_57 = arith.constant 0 : index
    %86 = vector.load %arg1[%c5, %c0_56, %c0_57] : memref<8x32x64xf32, #tpu.memory_space<vmem>>, vector<1x32x64xf32>
    %87 = vector.shape_cast %86 : vector<1x32x64xf32> to vector<32x64xf32>
    %cst_58 = arith.constant dense<0.000000e+00> : vector<2x64xf32>
    %88 = tpu.matmul %85, %87, %cst_58 {dimension_numbers = #tpu.dot_dimension_numbers<[1], [0], [0], [1], [0, 0, 1, 1], [], []>} : vector<2x32xf32>, vector<32x64xf32>, vector<2x64xf32> -> vector<2x64xf32>
    %c5_59 = arith.constant 5 : index
    %c0_60 = arith.constant 0 : index
    %89 = vector.load %arg2[%c5_59, %c0_60] : memref<8x64xf32, #tpu.memory_space<vmem>>, vector<1x64xf32>
    %90 = vector.broadcast %89 : vector<1x64xf32> to vector<2x64xf32>
    %91 = arith.addf %88, %90 : vector<2x64xf32>
    %92 = vector.extract_strided_slice %91 {offsets = [0, 0], sizes = [2, 32], strides = [1, 1]} : vector<2x64xf32> to vector<2x32xf32>
    %93 = vector.extract_strided_slice %91 {offsets = [0, 32], sizes = [2, 32], strides = [1, 1]} : vector<2x64xf32> to vector<2x32xf32>
    %94 = arith.negf %93 : vector<2x32xf32>
    %95 = math.exp %94 : vector<2x32xf32>
    %cst_61 = arith.constant 1.000000e+00 : f32
    %96 = vector.broadcast %cst_61 : f32 to vector<2x32xf32>
    %97 = arith.addf %96, %95 : vector<2x32xf32>
    %98 = arith.divf %96, %97 : vector<2x32xf32>
    %99 = arith.mulf %92, %98 : vector<2x32xf32>
    %c0_62 = arith.constant 0 : index
    %c160_63 = arith.constant 160 : index
    %100 = vector.load %arg3[%c0_62, %c160_63] : memref<2x256xf32, #tpu.memory_space<vmem>>, vector<2x32xf32>
    tpu.vector_store %arg3[%c0_62, %c160_63], %99 {strides = array<i32>} : memref<2x256xf32, #tpu.memory_space<vmem>>, vector<2x32xf32>,
    %c0_64 = arith.constant 0 : index
    %c160_65 = arith.constant 160 : index
    %101 = vector.load %arg4[%c0_64, %c160_65] : memref<2x256xf32, #tpu.memory_space<vmem>>, vector<2x32xf32>
    tpu.vector_store %arg4[%c0_64, %c160_65], %98 {strides = array<i32>} : memref<2x256xf32, #tpu.memory_space<vmem>>, vector<2x32xf32>,
    %c0_66 = arith.constant 0 : index
    %c192 = arith.constant 192 : index
    %102 = vector.load %arg0[%c0_66, %c192] : memref<2x256xf32, #tpu.memory_space<vmem>>, vector<2x32xf32>
    %c6 = arith.constant 6 : index
    %c0_67 = arith.constant 0 : index
    %c0_68 = arith.constant 0 : index
    %103 = vector.load %arg1[%c6, %c0_67, %c0_68] : memref<8x32x64xf32, #tpu.memory_space<vmem>>, vector<1x32x64xf32>
    %104 = vector.shape_cast %103 : vector<1x32x64xf32> to vector<32x64xf32>
    %cst_69 = arith.constant dense<0.000000e+00> : vector<2x64xf32>
    %105 = tpu.matmul %102, %104, %cst_69 {dimension_numbers = #tpu.dot_dimension_numbers<[1], [0], [0], [1], [0, 0, 1, 1], [], []>} : vector<2x32xf32>, vector<32x64xf32>, vector<2x64xf32> -> vector<2x64xf32>
    %c6_70 = arith.constant 6 : index
    %c0_71 = arith.constant 0 : index
    %106 = vector.load %arg2[%c6_70, %c0_71] : memref<8x64xf32, #tpu.memory_space<vmem>>, vector<1x64xf32>
    %107 = vector.broadcast %106 : vector<1x64xf32> to vector<2x64xf32>
    %108 = arith.addf %105, %107 : vector<2x64xf32>
    %109 = vector.extract_strided_slice %108 {offsets = [0, 0], sizes = [2, 32], strides = [1, 1]} : vector<2x64xf32> to vector<2x32xf32>
    %110 = vector.extract_strided_slice %108 {offsets = [0, 32], sizes = [2, 32], strides = [1, 1]} : vector<2x64xf32> to vector<2x32xf32>
    %111 = arith.negf %110 : vector<2x32xf32>
    %112 = math.exp %111 : vector<2x32xf32>
    %cst_72 = arith.constant 1.000000e+00 : f32
    %113 = vector.broadcast %cst_72 : f32 to vector<2x32xf32>
    %114 = arith.addf %113, %112 : vector<2x32xf32>
    %115 = arith.divf %113, %114 : vector<2x32xf32>
    %116 = arith.mulf %109, %115 : vector<2x32xf32>
    %c0_73 = arith.constant 0 : index
    %c192_74 = arith.constant 192 : index
    %117 = vector.load %arg3[%c0_73, %c192_74] : memref<2x256xf32, #tpu.memory_space<vmem>>, vector<2x32xf32>
    tpu.vector_store %arg3[%c0_73, %c192_74], %116 {strides = array<i32>} : memref<2x256xf32, #tpu.memory_space<vmem>>, vector<2x32xf32>,
    %c0_75 = arith.constant 0 : index
    %c192_76 = arith.constant 192 : index
    %118 = vector.load %arg4[%c0_75, %c192_76] : memref<2x256xf32, #tpu.memory_space<vmem>>, vector<2x32xf32>
    tpu.vector_store %arg4[%c0_75, %c192_76], %115 {strides = array<i32>} : memref<2x256xf32, #tpu.memory_space<vmem>>, vector<2x32xf32>,
    %c0_77 = arith.constant 0 : index
    %c224 = arith.constant 224 : index
    %119 = vector.load %arg0[%c0_77, %c224] : memref<2x256xf32, #tpu.memory_space<vmem>>, vector<2x32xf32>
    %c7 = arith.constant 7 : index
    %c0_78 = arith.constant 0 : index
    %c0_79 = arith.constant 0 : index
    %120 = vector.load %arg1[%c7, %c0_78, %c0_79] : memref<8x32x64xf32, #tpu.memory_space<vmem>>, vector<1x32x64xf32>
    %121 = vector.shape_cast %120 : vector<1x32x64xf32> to vector<32x64xf32>
    %cst_80 = arith.constant dense<0.000000e+00> : vector<2x64xf32>
    %122 = tpu.matmul %119, %121, %cst_80 {dimension_numbers = #tpu.dot_dimension_numbers<[1], [0], [0], [1], [0, 0, 1, 1], [], []>} : vector<2x32xf32>, vector<32x64xf32>, vector<2x64xf32> -> vector<2x64xf32>
    %c7_81 = arith.constant 7 : index
    %c0_82 = arith.constant 0 : index
    %123 = vector.load %arg2[%c7_81, %c0_82] : memref<8x64xf32, #tpu.memory_space<vmem>>, vector<1x64xf32>
    %124 = vector.broadcast %123 : vector<1x64xf32> to vector<2x64xf32>
    %125 = arith.addf %122, %124 : vector<2x64xf32>
    %126 = vector.extract_strided_slice %125 {offsets = [0, 0], sizes = [2, 32], strides = [1, 1]} : vector<2x64xf32> to vector<2x32xf32>
    %127 = vector.extract_strided_slice %125 {offsets = [0, 32], sizes = [2, 32], strides = [1, 1]} : vector<2x64xf32> to vector<2x32xf32>
    %128 = arith.negf %127 : vector<2x32xf32>
    %129 = math.exp %128 : vector<2x32xf32>
    %cst_83 = arith.constant 1.000000e+00 : f32
    %130 = vector.broadcast %cst_83 : f32 to vector<2x32xf32>
    %131 = arith.addf %130, %129 : vector<2x32xf32>
    %132 = arith.divf %130, %131 : vector<2x32xf32>
    %133 = arith.mulf %126, %132 : vector<2x32xf32>
    %c0_84 = arith.constant 0 : index
    %c224_85 = arith.constant 224 : index
    %134 = vector.load %arg3[%c0_84, %c224_85] : memref<2x256xf32, #tpu.memory_space<vmem>>, vector<2x32xf32>
    tpu.vector_store %arg3[%c0_84, %c224_85], %133 {strides = array<i32>} : memref<2x256xf32, #tpu.memory_space<vmem>>, vector<2x32xf32>,
    %c0_86 = arith.constant 0 : index
    %c224_87 = arith.constant 224 : index
    %135 = vector.load %arg4[%c0_86, %c224_87] : memref<2x256xf32, #tpu.memory_space<vmem>>, vector<2x32xf32>
    tpu.vector_store %arg4[%c0_86, %c224_87], %132 {strides = array<i32>} : memref<2x256xf32, #tpu.memory_space<vmem>>, vector<2x32xf32>,
    return
  }
}

</mosaic_0001>

<bundles_post_ra>
// kernel: sglu_forward.1
= control target key start
LH: loop header
LB: loop body
LE: loop exit
PB: predicated region body
PF: predicated region fallthrough
CT: control target
= control target key end

     0   :  { %10 = vsyncpa [#allocation3], 0  ;;  %s1271_s15 = smov [#allocation2]   ;;  %s1520_s0 = inlined_call_operand.vmem [shape: f32[2,256], index: 0, kind: input, shape index: {}]   ;;  %s1521_s1 = inlined_call_operand.hbm [shape: f32[8,32,64], index: 1, kind: input, shape index: {}]   ;;  %s1522_s2 = inlined_call_operand.vmem [shape: f32[8,64], index: 2, kind: input, shape index: {}]   ;;  %s1523_s3 = inlined_call_operand.vmem [shape: f32[2,256], index: 3, kind: output, shape index: {0}]   ;;  %s1524_s4 = inlined_call_operand.vmem [shape: f32[2,256], index: 4, kind: output, shape index: {1}]  }
   0x1   :  { %s18_s16 = sshll.u32 %s1271_s15, 4  ;;  %s1247_s19 = scalar_lea.hbm %s1521_s1, 4096  ;;  %s19_s16 = int_to_ptr.vmem [resolvable:$true] %s18_s16 }
   0x2   :  { %p1248_p0 = scmp.ne.s32.totalorder %s1521_s1, %s1247_s19  ;;  %p1251_p1 = scmp.lt.u32.totalorder %s1247_s19, %s1521_s1 }
   0x4   :  { %p1253_p2 = pnand %p1251_p1, %p1248_p0 }
   0x6   :  { %1256 = shalt.err (!%p1253_p2)
}
   0x7   :  { %s1257_s24 = scalar_lea.vmem %s19_s16, 4096  ;;  %p1262_p4 = scmp.lt.s32.totalorder %s19_s16, %s19_s16 }
   0x8   :  { %p1258_p3 = scmp.ne.s32.totalorder %s19_s16, %s1257_s24  ;;  %p1263_p5 = scmp.lt.s32.totalorder %s1257_s24, %s1257_s24 }
   0xa   :  { %p1264_p6 = por %p1263_p5, %p1262_p4 }
   0xc   :  { %p1265_p7 = pnand %p1264_p6, %p1258_p3 }
   0xe   :  { %1268 = shalt.err (!%p1265_p7)
}
   0xf   :  { %s1272_s25 = smov 128   ;;  %s1273_s26 = smov 8  }
  0x10   :  { %24 = dma.hbm_to_vmem [thread:$0]  %s1521_s1, 4096, %s19_s16, [#allocation3], %s1272_s25, %s1272_s25, %s1273_s26  }
  0x11   :  { %1269 = dma.done.wait [#allocation3], 4096  }
  0x12   :  { %1270 = vsyncadd [#allocation3], 4294963200  ;;  %v1274_v0 = vmov 0.0|0.0   ;;  %vm1275_vm0 = vmmov 0   ;;  %v1276_v1 = vmov 0.0   ;;  %v31_v3 = vld [vmem:[#allocation2] sm:$0xff] }
  0x13   :  { %1157 = vmatprep.subr.bf16.mxu0 %v1274_v0  ;;  %1163 = vmatprep.subr.bf16.mxu1 %v1274_v0  ;;  %v1003_v2 = vld.sshfl [vmem:[%s1520_s0] sm:$0x3 pattern:$0x76325410]  ;;  %v32_v4 = vld [vmem:[#allocation2 + $0x8] sm:$0xff]  ;;  %s1277_s1 = smov 96  }
  0x14   :  { %1077 = vmatprep.mubr.msk.f32.mxu0 %vm1275_vm0, %v1276_v1  ;;  %1088 = vmatprep.mubr.msk.f32.mxu1 %vm1275_vm0, %v1276_v1  ;;  %s1278_s5 = smov 32   ;;  %v1158_v5 = vpack.c.bf16 %v32_v4, %v31_v3  ;;  %v33_v6 = vld [vmem:[#allocation2 + $0x10] sm:$0xff]  ;;  %v34_v7 = vld [vmem:[#allocation2 + $0x18] sm:$0xff]  ;;  %v140_v9 = vld [vmem:[#allocation2 + $0x20] sm:$0xff]  ;;  %s1279_s8 = smov 64   ;;  %vm40_vm1 = vcmask 261120  }
  0x15   :  { %157 = vrot.lane.b32.xlu0 %v1003_v2, %s1277_s1  ;;  %403 = vrot.lane.b32.xlu1 %v1003_v2, %s1278_s5  ;;  %v1018_v8 = vld.sshfl [vmem:[%s1520_s0 + $0x2] sm:$0x3 pattern:$0x76325410]  ;;  %v141_v10 = vld [vmem:[#allocation2 + $0x28] sm:$0xff]  ;;  %v1161_v11 = vpack.c.bf16 %v34_v7, %v33_v6  ;;  %v142_v13 = vld [vmem:[#allocation2 + $0x30] sm:$0xff] }
  0x16   :  { %1159 = vmatpush3.bf16.msra.mxu0 %v1158_v5  ;;  %v1164_v12 = vpack.c.bf16 %v141_v10, %v140_v9  ;;  %v143_v14 = vld [vmem:[#allocation2 + $0x38] sm:$0xff]  ;;  %v258_v15 = vld [vmem:[#allocation2 + $0x40] sm:$0xff]  ;;  %v259_v16 = vld [vmem:[#allocation2 + $0x48] sm:$0xff]  ;;  %vm125_vm2 = vcmask 254976   ;;  %vm253_vm3 = vcmask 517376   ;;  %vm371_vm4 = vcmask 779776  }
  0x17   :  { %1160 = vmatprep.subr.bf16.mxu0 %v1274_v0  ;;  %v1167_v17 = vpack.c.bf16 %v143_v14, %v142_v13  ;;  %v30_v18 = vld [vmem:[%s1520_s0] sm:$0x3]  ;;  %v1170_v19 = vpack.c.bf16 %v259_v16, %v258_v15  ;;  %v260_v20 = vld [vmem:[#allocation2 + $0x50] sm:$0xff]  ;;  %v386_v23 = vld [vmem:[#allocation2 + $0x60] sm:$0xff]  ;;  %vm499_vm5 = vcmask 1042176  }
  0x18   :  { %1165 = vmatpush3.bf16.msra.mxu1 %v1164_v12  ;;  %v261_v21 = vld [vmem:[#allocation2 + $0x58] sm:$0xff]  ;;  %v387_v24 = vld [vmem:[#allocation2 + $0x68] sm:$0xff]  ;;  %v388_v26 = vld [vmem:[#allocation2 + $0x70] sm:$0xff] }
  0x19   :  { %275 = vrot.lane.b32.xlu0 %v1003_v2, %s1279_s8  ;;  %638 = vrot.lane.b32.xlu1 %v1018_v8, %s1277_s1  ;;  %v1173_v22 = vpack.c.bf16 %v261_v21, %v260_v20  ;;  %v1176_v25 = vpack.c.bf16 %v387_v24, %v386_v23  ;;  %v389_v27 = vld [vmem:[#allocation2 + $0x78] sm:$0xff]  ;;  %v514_v28 = vld [vmem:[#allocation2 + $0x80] sm:$0xff]  ;;  %v515_v29 = vld [vmem:[#allocation2 + $0x88] sm:$0xff] }
  0x1a   :  { %1162 = vmatpush3.bf16.msra.mxu0 %v1161_v11  ;;  %1166 = vmatprep.subr.bf16.mxu1 %v1274_v0  ;;  %v1179_v31 = vpack.c.bf16 %v389_v27, %v388_v26  ;;  %v1182_v32 = vpack.c.bf16 %v515_v29, %v514_v28  ;;  %v516_v33 = vld [vmem:[#allocation2 + $0x90] sm:$0xff]  ;;  %v517_v34 = vld [vmem:[#allocation2 + $0x98] sm:$0xff]  ;;  %v621_v35 = vld [vmem:[#allocation2 + $0xa0] sm:$0xff] }
  0x1b   :  { %1169 = vmatprep.subr.bf16.mxu0 %v1274_v0  ;;  %v622_v36 = vld [vmem:[#allocation2 + $0xa8] sm:$0xff]  ;;  %v1185_v39 = vpack.c.bf16 %v517_v34, %v516_v33  ;;  %v623_v41 = vld [vmem:[#allocation2 + $0xb0] sm:$0xff]  ;;  %v624_v42 = vld [vmem:[#allocation2 + $0xb8] sm:$0xff] }
  0x1c   :  { %1168 = vmatpush3.bf16.msra.mxu1 %v1167_v17  ;;  %v1188_v40 = vpack.c.bf16 %v622_v36, %v621_v35  ;;  %v738_v43 = vld [vmem:[#allocation2 + $0xc0] sm:$0xff]  ;;  %v739_v44 = vld [vmem:[#allocation2 + $0xc8] sm:$0xff]  ;;  %v512_v45 = vld [vmem:[%s1520_s0 + $0x2] sm:$0x3]  ;;  %v1191_v46 = vpack.c.bf16 %v624_v42, %v623_v41 }
  0x1d   :  { %755 = vrot.lane.b32.xlu0 %v1018_v8, %s1279_s8  ;;  %882 = vrot.lane.b32.xlu1 %v1018_v8, %s1278_s5  ;;  %v1194_v47 = vpack.c.bf16 %v739_v44, %v738_v43  ;;  %v740_v48 = vld [vmem:[#allocation2 + $0xd0] sm:$0xff]  ;;  %v741_v49 = vld [vmem:[#allocation2 + $0xd8] sm:$0xff]  ;;  %v865_v50 = vld [vmem:[#allocation2 + $0xe0] sm:$0xff] }
  0x1e   :  { %1078 = vmatmul.mubr.msk.f32.vlgmr.msra.gmra.mrb[0].mxu0 %vm40_vm1, %v30_v18  ;;  %1175 = vmatprep.subr.bf16.mxu1 %v1274_v0  ;;  %v866_v51 = vld [vmem:[#allocation2 + $0xe8] sm:$0xff]  ;;  %v1197_v53 = vpack.c.bf16 %v741_v49, %v740_v48  ;;  %v867_v55 = vld [vmem:[#allocation2 + $0xf0] sm:$0xff]  ;;  %v868_v56 = vld [vmem:[#allocation2 + $0xf8] sm:$0xff]  ;;  %v130_v48 = vlaneseq }
  0x1f   :  { %1171 = vmatpush3.bf16.msra.mxu0 %v1170_v19  ;;  %1099 = vmatprep.mubr.msk.f32.mxu0 %vm1275_vm0, %v1276_v1  ;;  %v1200_v54 = vpack.c.bf16 %v866_v51, %v865_v50  ;;  %v1203_v58 = vpack.c.bf16 %v868_v56, %v867_v55  ;;  %v1002_v62 = vld [vmem:[%s1522_s2 + $0x1] ss:$0 sm:$0xff]  ;;  %v1006_v3 = vld [vmem:[%s1522_s2 + $0x2] ss:$0 sm:$0xff]  ;;  %v1010_v9 = vld [vmem:[%s1522_s2 + $0x3] ss:$0 sm:$0xff] }
  0x20   :  { %1172 = vmatprep.subr.bf16.mxu0 %v1274_v0  ;;  %v1017_v18 = vld [vmem:[%s1522_s2 + $0x5] ss:$0 sm:$0xff]  ;;  %v1025_v34 = vld [vmem:[%s1522_s2 + $0x7] ss:$0 sm:$0xff] }
  0x23   :  { %1174 = vmatpush3.bf16.msra.mxu0 %v1173_v22  ;;  %v1014_v22 = vld [vmem:[%s1522_s2 + $0x4] ss:$0 sm:$0xff] }
  0x24   :  { %1181 = vmatprep.subr.bf16.mxu0 %v1274_v0 }
  0x87   :  { %v158_v30 = vpop.permute.xlu0 %157  ;;  %v404_v38 = vpop.permute.xlu1 %403 }
  0x88   :  { %1089 = vmatmul.mubr.msk.f32.vlgmr.msra.gmra.mrb[0].mxu1 %vm40_vm1, %v158_v30 }
  0x89   :  { %1177 = vmatpush3.bf16.msra.mxu1 %v1176_v25  ;;  %1110 = vmatprep.mubr.msk.f32.mxu1 %vm1275_vm0, %v1276_v1  ;;  %v1021_v25 = vld [vmem:[%s1522_s2 + $0x6] ss:$0 sm:$0xff] }
  0x8a   :  { %1178 = vmatprep.subr.bf16.mxu1 %v1274_v0 }
  0x8b   :  { %v276_v37 = vpop.permute.xlu0 %275  ;;  %v639_v52 = vpop.permute.xlu1 %638 }
  0x8c   :  { %1100 = vmatmul.mubr.msk.f32.vlgmr.msra.gmra.mrb[2].mxu0 %vm40_vm1, %v276_v37 }
  0x8d   :  { %1180 = vmatpush3.bf16.msra.mxu1 %v1179_v31  ;;  %1183 = vmatpush3.bf16.msra.mxu0 %v1182_v32 }
  0x8e   :  { %1184 = vmatprep.subr.bf16.mxu0 %v1274_v0  ;;  %1187 = vmatprep.subr.bf16.mxu1 %v1274_v0 }
  0x8f   :  { %1121 = vmatprep.mubr.msk.f32.mxu0 %vm1275_vm0, %v1276_v1  ;;  %v756_v57 = vpop.permute.xlu0 %755  ;;  %v883_v59 = vpop.permute.xlu1 %882 }
  0x90   :  { %1111 = vmatmul.mubr.msk.f32.vlgmr.msra.gmra.mrb[2].mxu1 %vm40_vm1, %v404_v38 }
  0x91   :  { %1186 = vmatpush3.bf16.msra.mxu0 %v1185_v39  ;;  %1189 = vmatpush3.bf16.msra.mxu1 %v1188_v40 }
  0x92   :  { %1190 = vmatprep.subr.bf16.mxu1 %v1274_v0  ;;  %1193 = vmatprep.subr.bf16.mxu0 %v1274_v0 }
  0x93   :  { %1132 = vmatprep.mubr.msk.f32.mxu1 %vm1275_vm0, %v1276_v1 }
  0x94   :  { %1122 = vmatmul.mubr.msk.f32.vlgmr.msra.gmra.mrb[4].mxu0 %vm40_vm1, %v512_v45 }
  0x95   :  { %1192 = vmatpush3.bf16.msra.mxu1 %v1191_v46  ;;  %1195 = vmatpush3.bf16.msra.mxu0 %v1194_v47  ;;  %v1280_v46 = vmov 1983009808  }
  0x96   :  { %1196 = vmatprep.subr.bf16.mxu0 %v1274_v0  ;;  %1199 = vmatprep.subr.bf16.mxu1 %v1274_v0  ;;  %v128_v47 = vunpack.c.l.s4 %v1280_v46 }
  0x97   :  { %1143 = vmatprep.mubr.msk.f32.mxu0 %vm1275_vm0, %v1276_v1 }
  0x98   :  { %1133 = vmatmul.mubr.msk.f32.vlgmr.msra.gmra.mrb[4].mxu1 %vm40_vm1, %v639_v52  ;;  %v129_v52 = vunpack.c.0.s8 %v128_v47 }
  0x99   :  { %1198 = vmatpush3.bf16.msra.mxu0 %v1197_v53  ;;  %1201 = vmatpush3.bf16.msra.mxu1 %v1200_v54  ;;  %v131_v53 = vshrl.u32 %v130_v48, 7 }
  0x9a   :  { %1202 = vmatprep.subr.bf16.mxu1 %v1274_v0  ;;  %1154 = vmatprep.mubr.msk.f32.mxu1 %vm1275_vm0, %v1276_v1  ;;  %v999_v0 = vld [vmem:[%s1522_s2] ss:$0 sm:$0xff] }
  0x9c   :  { %1144 = vmatmul.mubr.msk.f32.vlgmr.msra.gmra.mrb[6].mxu0 %vm40_vm1, %v756_v57 }
  0x9d   :  { %1204 = vmatpush3.bf16.msra.mxu1 %v1203_v58  ;;  %v132_v58 = vsub.s32 %v129_v52, %v131_v53 }
  0xa0   :  { %1155 = vmatmul.mubr.msk.f32.vlgmr.msra.gmra.mrb[6].mxu1 %vm40_vm1, %v883_v59 }
  0xf1   :  { %v110_v60 = vpop.f32.mrb[0].mxu0 }
  0xf2   :  { %v1079_v61 = vpop.f32.mrb[1].mxu0  ;;  %v1388_v5 = vadd.f32 %v999_v0, %v110_v60 }
  0xf4   :  { %v1001_v11 = vmul.f32 -1.442695, %v1388_v5 }
 0x15b   :  { %v227_v63 = vpop.f32.mrb[0].mxu1 }
 0x15c   :  { %v1382_v2 = vadd.f32 %v1002_v62, %v227_v63  ;;  %v1090_v1 = vpop.f32.mrb[1].mxu1 }
 0x15e   :  { %v1005_v4 = vmul.f32 -1.442695, %v1382_v2 }
 0x15f   :  { %v345_v6 = vpop.f32.mrb[2].mxu0 }
 0x160   :  { %1215 = vpow2.f32 %v1005_v4  ;;  %v1390_v7 = vadd.f32 %v1006_v3, %v345_v6  ;;  %v1101_v8 = vpop.f32.mrb[3].mxu0 }
 0x162   :  { %v1009_v10 = vmul.f32 -1.442695, %v1390_v7 }
 0x163   :  { %v473_v12 = vpop.f32.mrb[2].mxu1 }
 0x164   :  { %1217 = vpow2.f32 %v1009_v10  ;;  %v1397_v13 = vadd.f32 %v1010_v9, %v473_v12  ;;  %v1112_v14 = vpop.f32.mrb[3].mxu1 }
 0x165   :  { %1219 = vpow2.f32 %v1001_v11 }
 0x166   :  { %v1013_v15 = vmul.f32 -1.442695, %v1397_v13 }
 0x167   :  { %v592_v16 = vpop.f32.mrb[4].mxu0 }
 0x168   :  { %1221 = vpow2.f32 %v1013_v15  ;;  %v1123_v17 = vpop.f32.mrb[5].mxu0  ;;  %v1412_v29 = vadd.f32 %v1014_v22, %v592_v16 }
 0x16a   :  { %v1216_v19 = vpop.eup %1215  ;;  %v1016_v38 = vmul.f32 -1.442695, %v1412_v29 }
 0x16b   :  { %v234_v20 = vadd.f32 1.0, %v1216_v19  ;;  %v708_v21 = vpop.f32.mrb[4].mxu1 }
 0x16c   :  { %v1406_v23 = vadd.f32 %v1017_v18, %v708_v21  ;;  %v1134_v24 = vpop.f32.mrb[5].mxu1 }
 0x16d   :  { %1223 = vrcp.f32 %v234_v20 }
 0x16e   :  { %v1218_v26 = vpop.eup %1217  ;;  %v1020_v27 = vmul.f32 -1.442695, %v1406_v23 }
 0x16f   :  { %v352_v28 = vadd.f32 1.0, %v1218_v26  ;;  %v825_v30 = vpop.f32.mrb[6].mxu0  ;;  %v1220_v33 = vpop.eup %1219 }
 0x170   :  { %1225 = vpow2.f32 %v1020_v27  ;;  %v1414_v31 = vadd.f32 %v1021_v25, %v825_v30  ;;  %v1145_v32 = vpop.f32.mrb[7].mxu0  ;;  %v117_v42 = vadd.f32 1.0, %v1220_v33 }
 0x171   :  { %1227 = vrcp.f32 %v352_v28 }
 0x172   :  { %v1222_v35 = vpop.eup %1221  ;;  %v1024_v36 = vmul.f32 -1.442695, %v1414_v31 }
 0x173   :  { %v480_v37 = vadd.f32 1.0, %v1222_v35  ;;  %v952_v39 = vpop.f32.mrb[6].mxu1 }
 0x174   :  { %1229 = vpow2.f32 %v1024_v36  ;;  %v1421_v40 = vadd.f32 %v1025_v34, %v952_v39  ;;  %v1156_v41 = vpop.f32.mrb[7].mxu1 }
 0x175   :  { %1231 = vrcp.f32 %v480_v37 }
 0x176   :  { %v1028_v43 = vmul.f32 -1.442695, %v1421_v40  ;;  %1233 = vpow2.f32 %v1016_v38 }
 0x177   :  { %v1424_v44 = vpop.eup %1223 }
 0x178   :  { %1235 = vpow2.f32 %v1028_v43  ;;  %238 = vrot.lane.b32.xlu0 %v1424_v44, %s1277_s1 }
 0x179   :  { %1237 = vrcp.f32 %v117_v42 }
 0x17a   :  { %v1226_v45 = vpop.eup %1225 }
 0x17b   :  { %v1228_v49 = vpop.eup %1227  ;;  %v715_v50 = vadd.f32 1.0, %v1226_v45 }
 0x17c   :  { %356 = vrot.lane.b32.xlu0 %v1228_v49, %s1277_s1  ;;  %v379_v6 = vrot.slane %v1228_v49, %v132_v58 }
 0x17d   :  { %1239 = vrcp.f32 %v715_v50 }
 0x17e   :  { %v1230_v51 = vpop.eup %1229 }
 0x17f   :  { %v1232_v54 = vpop.eup %1231  ;;  %v832_v55 = vadd.f32 1.0, %v1230_v51 }
 0x180   :  { %484 = vrot.lane.b32.xlu0 %v1232_v54, %s1277_s1  ;;  %v1234_v56 = vpop.eup %1233  ;;  %v507_v9 = vrot.slane %v1232_v54, %v132_v58 }
 0x181   :  { %1241 = vrcp.f32 %v832_v55  ;;  %v599_v61 = vadd.f32 1.0, %v1234_v56 }
 0x182   :  { %v1236_v57 = vpop.eup %1235 }
 0x183   :  { %v1238_v59 = vpop.eup %1237  ;;  %v959_v60 = vadd.f32 1.0, %v1236_v57 }
 0x184   :  { %121 = vrot.lane.b32.xlu0 %v1238_v59, %s1277_s1  ;;  %v133_v62 = vrot.slane %v1238_v59, %v132_v58 }
 0x185   :  { %1243 = vrcp.f32 %v959_v60 }
 0x186   :  { %1245 = vrcp.f32 %v599_v61 }
 0x187   :  { %v1240_v63 = vpop.eup %1239 }
 0x188   :  { %719 = vrot.lane.b32.xlu1 %v1240_v63, %s1277_s1  ;;  %134 = vrot.lane.b32.xlu0 %v133_v62, %s1277_s1 }
 0x18b   :  { %v1242_v0 = vpop.eup %1241 }
 0x18c   :  { %836 = vrot.lane.b32.xlu1 %v1242_v0, %s1277_s1  ;;  %v858_v8 = vrot.slane %v1242_v0, %v132_v58 }
 0x18f   :  { %v1244_v1 = vpop.eup %1243 }
 0x190   :  { %963 = vrot.lane.b32.xlu1 %v1244_v1, %s1277_s1  ;;  %v1246_v3 = vpop.eup %1245  ;;  %v985_v26 = vrot.slane %v1244_v1, %v132_v58 }
 0x191   :  { %v614_v4 = vrot.slane %v1246_v3, %v132_v58 }
 0x194   :  { %603 = vrot.lane.b32.xlu1 %v1246_v3, %s1277_s1 }
 0x198   :  { %615 = vrot.lane.b32.xlu1 %v614_v4, %s1277_s1 }
 0x19c   :  { %380 = vrot.lane.b32.xlu1 %v379_v6, %s1278_s5 }
 0x1a0   :  { %859 = vrot.lane.b32.xlu1 %v858_v8, %s1278_s5 }
 0x1a4   :  { %508 = vrot.lane.b32.xlu1 %v507_v9, %s1279_s8 }
 0x1ea   :  { %v239_v10 = vpop.permute.xlu0 %238 }
 0x1eb   :  { %v241_v11 = vmul.f32 %v239_v10, %v1382_v2 }
 0x1ed   :  { %v249_v12 = vrot.slane %v241_v11, %v132_v58 }
 0x1ee   :  { %v357_v14 = vpop.permute.xlu0 %356 }
 0x1ef   :  { %v359_v15 = vmul.f32 %v357_v14, %v1390_v7  ;;  %250 = vrot.lane.b32.xlu0 %v249_v12, %s1278_s5 }
 0x1f1   :  { %v367_v16 = vrot.slane %v359_v15, %v132_v58 }
 0x1f2   :  { %v485_v17 = vpop.permute.xlu0 %484 }
 0x1f3   :  { %v487_v18 = vmul.f32 %v485_v17, %v1397_v13  ;;  %368 = vrot.lane.b32.xlu0 %v367_v16, %s1279_s8 }
 0x1f5   :  { %v495_v19 = vrot.slane %v487_v18, %v132_v58 }
 0x1f6   :  { %v122_v20 = vpop.permute.xlu0 %121 }
 0x1f7   :  { %v124_v21 = vmul.f32 %v122_v20, %v1388_v5  ;;  %496 = vrot.lane.b32.xlu0 %v495_v19, %s1277_s1 }
 0x1f9   :  { %126 = vst.msk [vmem:[%s1523_s3] sm:$0x3] %vm125_vm2, %v124_v21 }
 0x1fa   :  { %v720_v2 = vpop.permute.xlu1 %719  ;;  %v135_v7 = vpop.permute.xlu0 %134 }
 0x1fb   :  { %v722_v22 = vmul.f32 %v720_v2, %v1406_v23  ;;  %137 = vst.msk [vmem:[%s1524_s4] sm:$0x3] %vm125_vm2, %v135_v7 }
 0x1fc   :  { %255 = vst.msk [vmem:[%s1524_s4] sm:$0x3] %vm253_vm3, %v1424_v44 }
 0x1fd   :  { %v730_v5 = vrot.slane %v722_v22, %v132_v58 }
 0x1fe   :  { %v837_v13 = vpop.permute.xlu1 %836 }
 0x1ff   :  { %v839_v24 = vmul.f32 %v837_v13, %v1414_v31  ;;  %731 = vrot.lane.b32.xlu1 %v730_v5, %s1278_s5 }
 0x201   :  { %v847_v25 = vrot.slane %v839_v24, %v132_v58 }
 0x202   :  { %v964_v23 = vpop.permute.xlu1 %963 }
 0x203   :  { %v966_v27 = vmul.f32 %v964_v23, %v1421_v40  ;;  %848 = vrot.lane.b32.xlu0 %v847_v25, %s1279_s8  ;;  %986 = vrot.lane.b32.xlu1 %v985_v26, %s1279_s8 }
 0x205   :  { %v974_v28 = vrot.slane %v966_v27, %v132_v58 }
 0x206   :  { %v604_v30 = vpop.permute.xlu1 %603 }
 0x207   :  { %v606_v32 = vmul.f32 %v604_v30, %v1412_v29  ;;  %975 = vrot.lane.b32.xlu0 %v974_v28, %s1277_s1 }
 0x209   :  { %607 = vst.msk [vmem:[%s1523_s3 + $0x2] sm:$0x3] %vm125_vm2, %v606_v32 }
 0x20a   :  { %v616_v31 = vpop.permute.xlu1 %615 }
 0x20b   :  { %618 = vst.msk [vmem:[%s1524_s4 + $0x2] sm:$0x3] %vm125_vm2, %v616_v31 }
 0x20c   :  { %735 = vst.msk [vmem:[%s1524_s4 + $0x2] sm:$0x3] %vm253_vm3, %v1240_v63 }
 0x20e   :  { %v381_v29 = vpop.permute.xlu1 %380 }
 0x20f   :  { %383 = vst.msk [vmem:[%s1524_s4] sm:$0x3] %vm371_vm4, %v381_v29 }
 0x212   :  { %v860_v33 = vpop.permute.xlu1 %859 }
 0x213   :  { %862 = vst.msk [vmem:[%s1524_s4 + $0x2] sm:$0x3] %vm371_vm4, %v860_v33 }
 0x216   :  { %v509_v34 = vpop.permute.xlu1 %508 }
 0x217   :  { %511 = vst.msk [vmem:[%s1524_s4] sm:$0x3] %vm499_vm5, %v509_v34 }
 0x261   :  { %v251_v35 = vpop.permute.xlu0 %250 }
 0x262   :  { %254 = vst.msk [vmem:[%s1523_s3] sm:$0x3] %vm253_vm3, %v251_v35 }
 0x265   :  { %v369_v36 = vpop.permute.xlu0 %368 }
 0x266   :  { %372 = vst.msk [vmem:[%s1523_s3] sm:$0x3] %vm371_vm4, %v369_v36 }
 0x269   :  { %v497_v37 = vpop.permute.xlu0 %496 }
 0x26a   :  { %500 = vst.msk [vmem:[%s1523_s3] sm:$0x3] %vm499_vm5, %v497_v37 }
 0x271   :  { %v732_v38 = vpop.permute.xlu1 %731 }
 0x272   :  { %734 = vst.msk [vmem:[%s1523_s3 + $0x2] sm:$0x3] %vm253_vm3, %v732_v38 }
 0x275   :  { %v849_v39 = vpop.permute.xlu0 %848  ;;  %v987_v40 = vpop.permute.xlu1 %986 }
 0x276   :  { %851 = vst.msk [vmem:[%s1523_s3 + $0x2] sm:$0x3] %vm371_vm4, %v849_v39 }
 0x277   :  { %989 = vst.msk [vmem:[%s1524_s4 + $0x2] sm:$0x3] %vm499_vm5, %v987_v40 }
 0x279   :  { %v976_v41 = vpop.permute.xlu0 %975 }
 0x27a   :  { %978 = vst.msk [vmem:[%s1523_s3 + $0x2] sm:$0x3] %vm499_vm5, %v976_v41 }
 0x27b   :  { %998 = vsyncpa [#allocation3], 1 }

</bundles_post_ra>
